<compile_context>
chip_gen: v6e
topology: v6e:2x2x1
jax: 0.10.0
libtpu: 0.0.40
codegen_flags: <defaults>
</compile_context>

<pallas_src>
import jax
import jax.numpy as jnp
from jax.experimental import pallas as pl
from jax.experimental.pallas import tpu as pltpu


def _publisher_embedding_kernel(idx_ref, blkdiag_ref, out_ref):
    """Packed one-hot gather.

    idx_ref:     (TBg, pack)            int32  -- pack indices per packed row
    blkdiag_ref: (pack*Vp, pack*D)      f32    -- block-diagonal table copies
    out_ref:     (TBg, pack*D)          f32    -- pack embeddings per packed row
    """
    TBg, pack = idx_ref.shape
    PKV, _ = blkdiag_ref.shape
    Vp = PKV // pack

    idx = idx_ref[...]                                            # (TBg, pack)
    col = jax.lax.broadcasted_iota(jnp.int32, (TBg, PKV), 1)

    # Block-diagonal one-hot: onehot[i, r*Vp + v] = (idx[i, r] == v).
    # Shifting each sub-row's index by r*Vp confines its match to its own
    # Vp-wide column block; invalid / out-of-range indices are mapped to -1
    # so they match nothing -> all-zero embedding row.
    hits = None
    for r in range(pack):                     # pack is a small static int
        ir = idx[:, r:r + 1]                                      # (TBg, 1)
        shifted = jnp.where((ir >= 0) & (ir < Vp), ir + r * Vp, -1)
        m = (col == shifted)
        hits = m if hits is None else (hits | m)
    onehot = hits.astype(jnp.float32)                             # (TBg, PKV)

    # Single MXU matmul (K = pack*Vp = 256, N = pack*D = 128 for Vp=64, D=32)
    # followed by one lane-dense, full-width store of the output tile.
    out_ref[...] = jnp.dot(onehot, blkdiag_ref[...],
                           preferred_element_type=jnp.float32)


def item_embedding_db(item_fea, publisher_table, *, block_rows=1024):
    """Forward pass of ItemEmbeddingDB: publisher_table[item_fea[:, 1]].

    item_fea:        (B, n_feat) integer features; only column 1 is used.
    publisher_table: (Vp, D) float32 embedding table.
    Returns:         (B, D) float32 publisher embeddings.
    """
    B, _ = item_fea.shape
    Vp, D = publisher_table.shape

    # TODO(synk): for large publisher vocabularies (Vp beyond ~2K) replace the
    # one-hot MXU gather with a manual DMA row gather (memory_space=pl.ANY).

    # Lane packing factor: pack batch rows until the output row is 128 lanes.
    pack = 128 // D if (D < 128 and 128 % D == 0) else 1
    quant = 8 * pack                 # row quantum: 8 sublanes of packed rows

    # ---- batch tile size ----------------------------------------------------
    # Large tiles amortise the ~0.35us per-grid-step overhead; cap by the
    # (tb/pack, pack*Vp) one-hot staging (<= ~4 MiB VMEM) and by the padded
    # batch, and keep >= 2 grid steps whenever the batch allows (pipelining,
    # v7x two-TensorCore sharding of the "parallel" axis).
    tb = max(quant, (block_rows // quant) * quant)
    onehot_cap = max(quant, (((4 << 20) // (4 * Vp)) // quant) * quant)
    tb = min(tb, onehot_cap)
    tb = min(tb, pl.cdiv(B, quant) * quant)
    if B > quant and pl.cdiv(B, tb) < 2:
        tb = max(quant, (B // (2 * quant)) * quant)
    grid_steps = pl.cdiv(B, tb)
    B_pad = grid_steps * tb

    # ---- wrapper-side prep (O(B) ints + O(pack^2*Vp*D) table, all cheap) ----
    # Only column 1 is DMA'd into the kernel (4 B/row instead of n_feat*4).
    # NOTE: indices are cast to int32; int64 ids >= 2**31 would wrap.
    pub_idx = item_fea[:, 1].astype(jnp.int32)
    pub_idx = jnp.pad(pub_idx, (0, B_pad - B))     # padded rows sliced off below
    idx_grouped = pub_idx.reshape(B_pad // pack, pack)

    # Block-diagonal table: blkdiag[r*Vp + v, r*D + d] = table[v, d].
    tab = publisher_table.astype(jnp.float32)
    blkdiag = jnp.zeros((pack * Vp, pack * D), jnp.float32)
    for r in range(pack):
        blkdiag = blkdiag.at[r * Vp:(r + 1) * Vp, r * D:(r + 1) * D].set(tab)

    TBg = tb // pack
    out_packed = pl.pallas_call(
        _publisher_embedding_kernel,
        out_shape=jax.ShapeDtypeStruct((B_pad // pack, pack * D), jnp.float32),
        grid=(grid_steps,),
        in_specs=[
            # Batch-tiled packed indices (double-buffered across grid steps).
            pl.BlockSpec((TBg, pack), lambda i: (i, 0)),
            # Block-diagonal table: constant index_map -> VMEM-resident, no
            # re-DMA across steps.  (For very large tables on v7x, consider
            # pipeline_mode=pl.Buffered(1) / a larger vmem_limit_bytes.)
            pl.BlockSpec((pack * Vp, pack * D), lambda i: (0, 0)),
        ],
        out_specs=pl.BlockSpec((TBg, pack * D), lambda i: (i, 0)),
        compiler_params=pltpu.CompilerParams(
            dimension_semantics=("parallel",)),
    )(idx_grouped, blkdiag)

    # (B_pad//pack, pack*D) and (B_pad, D) share the same row-major layout,
    # so this reshape is free; then drop the padded rows.
    return out_packed.reshape(B_pad, D)[:B]


if __name__ == "__main__":
    # Small config consistent with the module's config dict.
    num_publisher = 64
    num_author = 128          # constructed by the module but unused in forward()
    embedding_dim = 32
    batch = 70                # non-multiple of the tile -> exercises padding path
    n_feat = 4                # item_fea columns; forward() uses column 1 only

    key = jax.random.PRNGKey(0)
    k1, k2, k3 = jax.random.split(key, 3)

    # torch.nn.Embedding default init: N(0, 1).
    publisher_table = jax.random.normal(
        k1, (num_publisher, embedding_dim), jnp.float32)

    # Deterministic example item_fea (integer categorical features).
    col_publisher = jax.random.randint(k2, (batch, 1), 0, num_publisher, jnp.int32)
    col_other = jax.random.randint(k3, (batch, n_feat - 1), 0, 8, jnp.int32)
    item_fea = jnp.concatenate(
        [col_other[:, :1], col_publisher, col_other[:, 1:]], axis=1)   # (B, 4)

    out = item_embedding_db(item_fea, publisher_table)
    out = jax.block_until_ready(out)

    # Pure-JAX reference: publisher_table[item_fea[:, 1]].
    ref = publisher_table[item_fea[:, 1]]
    assert out.shape == (batch, embedding_dim)
    assert jnp.allclose(out, ref, atol=1e-5), "mismatch vs reference gather"

    print("KERNEL_OK")
</pallas_src>

<mosaic_0001>
module attributes {stable_mosaic.version = 11 : i64} {
  func.func @_publisher_embedding_kernel(%arg0: i32, %arg1: memref<8x4xi32, #tpu.memory_space<vmem>>, %arg2: memref<256x128xf32, #tpu.memory_space<vmem>>, %arg3: memref<8x128xf32, #tpu.memory_space<vmem>>) attributes {dimension_semantics = [#tpu.dimension_semantics<parallel>], iteration_bounds = array<i64: 3>, scalar_prefetch = 0 : i64, scratch_operands = 0 : i64, tpu.core_type = #tpu.core_type<tc>, window_params = [{transform_indices = @transform_0, window_bounds = array<i64: 8, 4>}, {pipeline_mode = #tpu.pipeline_mode<synchronous>, transform_indices = @transform_1, window_bounds = array<i64: 256, 128>}, {transform_indices = @transform_2, window_bounds = array<i64: 8, 128>}]} {
    %c0 = arith.constant 0 : index
    %c0_0 = arith.constant 0 : index
    %0 = vector.load %arg1[%c0, %c0_0] : memref<8x4xi32, #tpu.memory_space<vmem>>, vector<8x4xi32>
    %1 = tpu.iota {dimensions = array<i32: 1>} : vector<8x256xi32>
    %2 = vector.extract_strided_slice %0 {offsets = [0, 0], sizes = [8, 1], strides = [1, 1]} : vector<8x4xi32> to vector<8x1xi32>
    %c0_i32 = arith.constant 0 : i32
    %3 = vector.broadcast %c0_i32 : i32 to vector<8x1xi32>
    %4 = arith.cmpi sge, %2, %3 : vector<8x1xi32>
    %c64_i32 = arith.constant 64 : i32
    %5 = vector.broadcast %c64_i32 : i32 to vector<8x1xi32>
    %6 = arith.cmpi slt, %2, %5 : vector<8x1xi32>
    %7 = arith.andi %4, %6 : vector<8x1xi1>
    %c0_i32_1 = arith.constant 0 : i32
    %8 = vector.broadcast %c0_i32_1 : i32 to vector<8x1xi32>
    %9 = arith.addi %2, %8 : vector<8x1xi32>
    %c-1_i32 = arith.constant -1 : i32
    %10 = vector.broadcast %c-1_i32 : i32 to vector<8x1xi32>
    %11 = arith.select %7, %9, %10 : vector<8x1xi1>, vector<8x1xi32>
    %12 = vector.broadcast %11 : vector<8x1xi32> to vector<8x256xi32>
    %13 = arith.cmpi eq, %1, %12 : vector<8x256xi32>
    %14 = vector.extract_strided_slice %0 {offsets = [0, 1], sizes = [8, 1], strides = [1, 1]} : vector<8x4xi32> to vector<8x1xi32>
    %c0_i32_2 = arith.constant 0 : i32
    %15 = vector.broadcast %c0_i32_2 : i32 to vector<8x1xi32>
    %16 = arith.cmpi sge, %14, %15 : vector<8x1xi32>
    %c64_i32_3 = arith.constant 64 : i32
    %17 = vector.broadcast %c64_i32_3 : i32 to vector<8x1xi32>
    %18 = arith.cmpi slt, %14, %17 : vector<8x1xi32>
    %19 = arith.andi %16, %18 : vector<8x1xi1>
    %c64_i32_4 = arith.constant 64 : i32
    %20 = vector.broadcast %c64_i32_4 : i32 to vector<8x1xi32>
    %21 = arith.addi %14, %20 : vector<8x1xi32>
    %c-1_i32_5 = arith.constant -1 : i32
    %22 = vector.broadcast %c-1_i32_5 : i32 to vector<8x1xi32>
    %23 = arith.select %19, %21, %22 : vector<8x1xi1>, vector<8x1xi32>
    %24 = vector.broadcast %23 : vector<8x1xi32> to vector<8x256xi32>
    %25 = arith.cmpi eq, %1, %24 : vector<8x256xi32>
    %26 = arith.ori %13, %25 : vector<8x256xi1>
    %27 = vector.extract_strided_slice %0 {offsets = [0, 2], sizes = [8, 1], strides = [1, 1]} : vector<8x4xi32> to vector<8x1xi32>
    %c0_i32_6 = arith.constant 0 : i32
    %28 = vector.broadcast %c0_i32_6 : i32 to vector<8x1xi32>
    %29 = arith.cmpi sge, %27, %28 : vector<8x1xi32>
    %c64_i32_7 = arith.constant 64 : i32
    %30 = vector.broadcast %c64_i32_7 : i32 to vector<8x1xi32>
    %31 = arith.cmpi slt, %27, %30 : vector<8x1xi32>
    %32 = arith.andi %29, %31 : vector<8x1xi1>
    %c128_i32 = arith.constant 128 : i32
    %33 = vector.broadcast %c128_i32 : i32 to vector<8x1xi32>
    %34 = arith.addi %27, %33 : vector<8x1xi32>
    %c-1_i32_8 = arith.constant -1 : i32
    %35 = vector.broadcast %c-1_i32_8 : i32 to vector<8x1xi32>
    %36 = arith.select %32, %34, %35 : vector<8x1xi1>, vector<8x1xi32>
    %37 = vector.broadcast %36 : vector<8x1xi32> to vector<8x256xi32>
    %38 = arith.cmpi eq, %1, %37 : vector<8x256xi32>
    %39 = arith.ori %26, %38 : vector<8x256xi1>
    %40 = vector.extract_strided_slice %0 {offsets = [0, 3], sizes = [8, 1], strides = [1, 1]} : vector<8x4xi32> to vector<8x1xi32>
    %c0_i32_9 = arith.constant 0 : i32
    %41 = vector.broadcast %c0_i32_9 : i32 to vector<8x1xi32>
    %42 = arith.cmpi sge, %40, %41 : vector<8x1xi32>
    %c64_i32_10 = arith.constant 64 : i32
    %43 = vector.broadcast %c64_i32_10 : i32 to vector<8x1xi32>
    %44 = arith.cmpi slt, %40, %43 : vector<8x1xi32>
    %45 = arith.andi %42, %44 : vector<8x1xi1>
    %c192_i32 = arith.constant 192 : i32
    %46 = vector.broadcast %c192_i32 : i32 to vector<8x1xi32>
    %47 = arith.addi %40, %46 : vector<8x1xi32>
    %c-1_i32_11 = arith.constant -1 : i32
    %48 = vector.broadcast %c-1_i32_11 : i32 to vector<8x1xi32>
    %49 = arith.select %45, %47, %48 : vector<8x1xi1>, vector<8x1xi32>
    %50 = vector.broadcast %49 : vector<8x1xi32> to vector<8x256xi32>
    %51 = arith.cmpi eq, %1, %50 : vector<8x256xi32>
    %52 = arith.ori %39, %51 : vector<8x256xi1>
    %53 = arith.extui %52 : vector<8x256xi1> to vector<8x256xi32>
    %54 = arith.sitofp %53 : vector<8x256xi32> to vector<8x256xf32>
    %c0_12 = arith.constant 0 : index
    %c0_13 = arith.constant 0 : index
    %55 = vector.load %arg2[%c0_12, %c0_13] : memref<256x128xf32, #tpu.memory_space<vmem>>, vector<256x128xf32>
    %cst = arith.constant dense<0.000000e+00> : vector<8x128xf32>
    %56 = tpu.matmul %54, %55, %cst {dimension_numbers = #tpu.dot_dimension_numbers<[1], [0], [0], [1], [0, 0, 1, 1], [], []>} : vector<8x256xf32>, vector<256x128xf32>, vector<8x128xf32> -> vector<8x128xf32>
    %c0_14 = arith.constant 0 : index
    %c0_15 = arith.constant 0 : index
    %57 = vector.load %arg3[%c0_14, %c0_15] : memref<8x128xf32, #tpu.memory_space<vmem>>, vector<8x128xf32>
    tpu.vector_store %arg3[%c0_14, %c0_15], %56 {strides = array<i32>} : memref<8x128xf32, #tpu.memory_space<vmem>>, vector<8x128xf32>,
    return
  }
  func.func @transform_0(%arg0: i32) -> (i32, i32) {
    %c0_i32 = arith.constant 0 : i32
    %c0_i32_0 = arith.constant 0 : i32
    return %arg0, %c0_i32 : i32, i32
  }
  func.func @transform_1(%arg0: i32) -> (i32, i32) {
    %c0_i32 = arith.constant 0 : i32
    %c0_i32_0 = arith.constant 0 : i32
    %c0_i32_1 = arith.constant 0 : i32
    return %c0_i32, %c0_i32_0 : i32, i32
  }
  func.func @transform_2(%arg0: i32) -> (i32, i32) {
    %c0_i32 = arith.constant 0 : i32
    %c0_i32_0 = arith.constant 0 : i32
    return %arg0, %c0_i32 : i32, i32
  }
}

</mosaic_0001>

<bundles_post_ra>
// kernel: tpu_custom_call.1
= control target key start
LH: loop header
LB: loop body
LE: loop exit
PB: predicated region body
PF: predicated region fallthrough
CT: control target
= control target key end

     0   :  { %7 = vsyncpa [#allocation3], 0  ;;  %s732_s0 = inlined_call_operand.vmem [shape: s32[24,4], index: 0, kind: input, shape index: {}]   ;;  %s733_s1 = inlined_call_operand.hbm [shape: f32[256,128], index: 1, kind: input, shape index: {}]   ;;  %s734_s2 = inlined_call_operand.hbm [shape: f32[24,128], index: 2, kind: output, shape index: {}]  }
   0x1   :  { %8 = vsyncpa [#allocation4], 0 }
   0x2   :  { %10 = vsyncpa [#allocation4 + $0x1], 0  ;;  %s615_s9 = smov 0   ;;  %s617_s10 = smov 0  }
   0x3   :  { %s619_s11 = smov 0   ;;  %s621_s12 = smov 0  }
   0x4 LB: > { %s636_s13 = sadd.s32 4294967295, %s589_s12   ;;  %s386_s14 = sadd.s32 4294967294, %s589_s12   ;;  %s589_s12 = sphi %s621_s12, %s744_s12   ;;  %s585_s11 = sphi %s619_s11, %s743_s11   ;;  %s581_s10 = sphi %s617_s10, %s742_s10   ;;  %s577_s9 = sphi %s615_s9, %s741_s9  }
   0x5   : > { %s640_s15 = sadd.s32 1, %s589_s12   ;;  %s70_s16 = sadd.s32 1, %s585_s11 }
   0x6   : > { %s67_s17 = ssub.s32 %s589_s12, %s640_s15  ;;  %p80_p0 = scmp.ne.s32.totalorder %s585_s11, %s581_s10 }
   0x7   : > { %p68_p1 = scmp.eq.s32.totalorder %s67_s17, 0  ;;  %p81_p2 = scmp.eq.s32.totalorder %s636_s13, 2 }
   0x8   : > { %p86_p3 = scmp.ne.s32.totalorder %s581_s10, %s577_s9  ;;  %p87_p4 = scmp.eq.s32.totalorder %s386_s14, 2 }
   0x9   : > { %s651_s18 = scalar_select %p68_p1, %s585_s11, %s70_s16  }
   0xa   : > { %p653_p5 = por %p81_p2, %p80_p0  ;;  %p657_p6 = por %p87_p4, %p86_p3 }
   0xb   : > { %p387_p7 = scmp.ge.s32.totalorder %s589_s12, 1  ;;  %p94_p8 = scmp.lt.s32.totalorder %s589_s12, 4 }
   0xc   : > { %s736_s20 = scalar_select %p657_p6, 1, 0 }
   0xd   : > { %p451_p9 = scmp.eq.s32.totalorder %s636_s13, 0  ;;  %p664_p10 = pnand %p387_p7, %p94_p8 }
   0xe   : > { %s591_s22 = smov [#allocation2]  }
   0xf   : > { %s106_s23 = sshll.u32 %s591_s22, 4  ;;  %p443_p11 = pneg %p664_p10  ;;  %s107_s23 = int_to_ptr.vmem [resolvable:$true] %s106_s23 }
  0x10   : > { %s510_s24 = scalar_lea.vmem %s107_s23, 4096  ;;  %p518_p3 = scmp.lt.s32.totalorder %s107_s23, %s107_s23 }
  0x11   : > { %p444_p12 = pnand %p451_p9, %p443_p11  ;;  %p511_p0 = scmp.ne.s32.totalorder %s107_s23, %s510_s24 }
  0x12   : > { %p519_p4 = scmp.lt.s32.totalorder %s510_s24, %s510_s24 }
  0x13   : > { %p501_p13 = pneg %p444_p12 }
  0x14   : > { %p520_p6 = por %p519_p4, %p518_p3 }
  0x15   : > { %p513_p1 = pnand %p511_p0, %p501_p13 }
  0x17   : > { %p514_p2 = pneg %p513_p1 }
  0x19   : > { %p521_p7 = pnand %p520_p6, %p514_p2 }
  0x1b   : > { %524 = shalt.err (!%p521_p7)
}
  0x1c   : > { %s592_s25 = smov 128   ;;  %s593_s26 = smov 8  }
  0x1d   : > { %446 = dma.hbm_to_vmem [thread:$0]  (!%p444_p12), %s733_s1, 4096, %s107_s23, [#allocation3], %s592_s25, %s592_s25, %s593_s26  }
  0x1e   : > { %129 = sbr.rel (%p664_p10) target bundleno = 393 (0x189), region = 28 }
  0x23   : > { %568 = dma.done.wait (%p451_p9), [#allocation3], 4096  }
  0x24   : > { %570 = vsyncadd (%p451_p9), [#allocation3], 4294963200  ;;  %p150_p8 = scmp.lt.s32.totalorder %s636_s13, 2  ;;  %v594_v0 = vmov 0   ;;  %v595_v1 = vmov 2   ;;  %v229_v3 = vld [vmem:[#allocation2 + $0xf8] sm:$0xff]  ;;  %v155_v45 = vlaneseq }
  0x25   : > { %494 = vset.pattern.permute.xlu0 %v594_v0  ;;  %496 = vset.pattern.permute.xlu1 %v595_v1  ;;  %v213_v4 = vld [vmem:[#allocation2 + $0x78] sm:$0xff]  ;;  %v228_v6 = vld [vmem:[#allocation2 + $0xf0] sm:$0xff]  ;;  %v227_v13 = vld [vmem:[#allocation2 + $0xe8] sm:$0xff]  ;;  %v596_v18 = vmov 1   ;;  %v597_v19 = vmov 3   ;;  %v598_v52 = vmov 1.0  }
  0x26   : > { %s151_s29 = scalar_select %p150_p8, %s636_s13, 2  ;;  %402 = vmatprep.subr.mxu0 %v229_v3  ;;  %v212_v10 = vld [vmem:[#allocation2 + $0x70] sm:$0xff]  ;;  %v211_v14 = vld [vmem:[#allocation2 + $0x68] sm:$0xff]  ;;  %v226_v17 = vld [vmem:[#allocation2 + $0xe0] sm:$0xff]  ;;  %v156_v46 = vand.u32 127, %v155_v45 }
  0x27   : > { %403 = vmatpush3.msra.mxu0 %v213_v4  ;;  %v210_v20 = vld [vmem:[#allocation2 + $0x60] sm:$0xff]  ;;  %v225_v21 = vld [vmem:[#allocation2 + $0xd8] sm:$0xff]  ;;  %v224_v23 = vld [vmem:[#allocation2 + $0xd0] sm:$0xff]  ;;  %s147_s6 = sand.u32 1, %s581_s10   ;;  %s399_s8 = sshll.u32 %s636_s13, 7 }
  0x28   : > { %s393_s30 = sshll.u32 %s151_s29, 3  ;;  %404 = vmatprep.subr.mxu0 %v228_v6  ;;  %v209_v22 = vld [vmem:[#allocation2 + $0x58] sm:$0xff]  ;;  %v208_v24 = vld [vmem:[#allocation2 + $0x50] sm:$0xff]  ;;  %v223_v25 = vld [vmem:[#allocation2 + $0xc8] sm:$0xff]  ;;  %v157_v49 = vadd.s32 128, %v156_v46  ;;  %s392_s7 = sshll.u32 %s147_s6, 3 }
  0x29   : > { %s153_s5 = scalar_lea.vmem %s732_s0, %s393_s30  ;;  %405 = vmatpush3.msra.mxu0 %v212_v10  ;;  %v207_v26 = vld [vmem:[#allocation2 + $0x48] sm:$0xff]  ;;  %v222_v27 = vld [vmem:[#allocation2 + $0xc0] sm:$0xff]  ;;  %v221_v29 = vld [vmem:[#allocation2 + $0xb8] sm:$0xff]  ;;  %s149_s14 = scalar_lea.vmem [#allocation5], %s392_s7 }
  0x2a   : > { %v154_v2 = vld [vmem:[%s153_s5] sm:$0xff]  ;;  %406 = vmatprep.subr.mxu0 %v227_v13  ;;  %v205_v30 = vld [vmem:[#allocation2 + $0x38] sm:$0xff]  ;;  %v220_v31 = vld [vmem:[#allocation2 + $0xb0] sm:$0xff]  ;;  %s315_s16 = sshll.u32 %s149_s14, 4  ;;  %s313_s22 = scalar_lea.hbm %s734_s2, %s399_s8  ;;  %s316_s16 = int_to_ptr.vmem [resolvable:$true] %s315_s16 }
  0x2b   : > { %vm158_vm0 = vcmp.ge.s32.totalorder %v154_v2, 0  ;;  %vm159_vm1 = vcmp.lt.s32.totalorder %v154_v2, 64  ;;  %v176_v5 = vadd.s32 128, %v154_v2  ;;  %v167_v8 = vadd.s32 64, %v154_v2  ;;  %407 = vmatpush3.msra.mxu0 %v211_v14  ;;  %v206_v28 = vld [vmem:[#allocation2 + $0x40] sm:$0xff]  ;;  %v204_v32 = vld [vmem:[#allocation2 + $0x30] sm:$0xff] }
  0x2c   : > { %vm686_vm2 = vmand %vm158_vm0, %vm159_vm1  ;;  %v185_v9 = vadd.s32 192, %v154_v2  ;;  %408 = vmatprep.subr.mxu0 %v226_v17  ;;  %v219_v33 = vld [vmem:[#allocation2 + $0xa8] sm:$0xff]  ;;  %v218_v35 = vld [vmem:[#allocation2 + $0xa0] sm:$0xff]  ;;  %s302_s23 = scalar_lea.sflag [#allocation4], %s147_s6  ;;  %s525_s24 = scalar_lea.vmem %s316_s16, 128 }
  0x2d   : > { %v161_v11 = vsel %vm686_vm2, %v154_v2, 4294967295  ;;  %v177_v12 = vsel %vm686_vm2, %v176_v5, 4294967295  ;;  %v168_v15 = vsel %vm686_vm2, %v167_v8, 4294967295  ;;  %409 = vmatpush3.msra.mxu0 %v210_v20  ;;  %v203_v34 = vld [vmem:[#allocation2 + $0x28] sm:$0xff]  ;;  %v202_v36 = vld [vmem:[#allocation2 + $0x20] sm:$0xff]  ;;  %v217_v37 = vld [vmem:[#allocation2 + $0x98] sm:$0xff]  ;;  %p526_p6 = scmp.ne.s32.totalorder %s316_s16, %s525_s24 }
  0x2e   : > { %163 = vperm.xlu0 %494, %v161_v11   ;;  %179 = vperm.xlu1 %496, %v177_v12   ;;  %v186_v16 = vsel %vm686_vm2, %v185_v9, 4294967295  ;;  %v201_v38 = vld [vmem:[#allocation2 + $0x18] sm:$0xff]  ;;  %v216_v39 = vld [vmem:[#allocation2 + $0x90] sm:$0xff]  ;;  %v215_v41 = vld [vmem:[#allocation2 + $0x88] sm:$0xff]  ;;  %s599_s25 = smov [#allocation5]  }
  0x2f   : > { %410 = vmatprep.subr.mxu0 %v225_v21  ;;  %v200_v40 = vld [vmem:[#allocation2 + $0x10] sm:$0xff]  ;;  %v199_v42 = vld [vmem:[#allocation2 + $0x8] sm:$0xff]  ;;  %v214_v43 = vld [vmem:[#allocation2 + $0x80] sm:$0xff]  ;;  %p527_p9 = pnand %p526_p6, %p653_p5  ;;  %s529_s26 = sshll.u32 %s599_s25, 4  ;;  %s530_s26 = int_to_ptr.vmem [resolvable:$false] %s529_s26 }
  0x30   : > { %411 = vmatpush3.msra.mxu0 %v209_v22  ;;  %v198_v44 = vld [vmem:[#allocation2] sm:$0xff]  ;;  %s531_s13 = scalar_lea.vmem %s530_s26, 256  ;;  %p532_p11 = scmp.lt.s32.totalorder %s316_s16, %s530_s26 }
  0x31   : > { %412 = vmatprep.subr.mxu0 %v224_v23  ;;  %p528_p10 = pneg %p527_p9  ;;  %p533_p12 = scmp.lt.s32.totalorder %s531_s13, %s525_s24 }
  0x32   : > { %495 = vset.pattern.permute.xlu0 %v596_v18  ;;  %497 = vset.pattern.permute.xlu1 %v597_v19 }
  0x33   : > { %170 = vperm.xlu0 %495, %v168_v15   ;;  %188 = vperm.xlu1 %497, %v186_v16   ;;  %p534_p13 = por %p533_p12, %p532_p11 }
  0x34   : > { %413 = vmatpush3.msra.mxu0 %v208_v24 }
  0x35   : > { %414 = vmatprep.subr.mxu0 %v223_v25  ;;  %p535_p0 = pnand %p534_p13, %p528_p10 }
  0x36   : > { %415 = vmatpush3.msra.mxu0 %v207_v26 }
  0x37   : > { %498 = vset.pattern.permute.xlu0 %v597_v19  ;;  %416 = vmatprep.subr.mxu0 %v222_v27 }
  0x38   : > { %417 = vmatpush3.msra.mxu0 %v206_v28 }
  0x39   : > { %418 = vmatprep.subr.mxu0 %v221_v29 }
  0x3a   : > { %419 = vmatpush3.msra.mxu0 %v205_v30 }
  0x3b   : > { %420 = vmatprep.subr.mxu0 %v220_v31 }
  0x3c   : > { %421 = vmatpush3.msra.mxu0 %v204_v32 }
  0x3d   : > { %422 = vmatprep.subr.mxu0 %v219_v33 }
  0x3e   : > { %423 = vmatpush3.msra.mxu0 %v203_v34 }
  0x3f   : > { %424 = vmatprep.subr.mxu0 %v218_v35 }
  0x40   : > { %425 = vmatpush3.msra.mxu0 %v202_v36 }
  0x41   : > { %426 = vmatprep.subr.mxu0 %v217_v37 }
  0x42   : > { %427 = vmatpush3.msra.mxu0 %v201_v38 }
  0x43   : > { %428 = vmatprep.subr.mxu0 %v216_v39 }
  0x44   : > { %429 = vmatpush3.msra.mxu0 %v200_v40 }
  0x45   : > { %430 = vmatprep.subr.mxu0 %v215_v41 }
  0x46   : > { %431 = vmatpush3.msra.mxu0 %v199_v42 }
  0x47   : > { %432 = vmatprep.subr.mxu0 %v214_v43 }
  0x48   : > { %433 = vmatpush3.msra.mxu0 %v198_v44 }
  0xa9   : > { %v164_v47 = vpop.permute.xlu0 %163  ;;  %v180_v48 = vpop.permute.xlu1 %179 }
  0xaa   : > { %vm165_vm3 = vcmp.eq.s32.totalorder %v156_v46, %v164_v47  ;;  %vm166_vm6 = vcmp.eq.s32.totalorder %v157_v49, %v164_v47  ;;  %vm181_vm9 = vcmp.eq.s32.totalorder %v156_v46, %v180_v48  ;;  %vm182_vm13 = vcmp.eq.s32.totalorder %v157_v49, %v180_v48 }
  0xae   : > { %v171_v50 = vpop.permute.xlu0 %170  ;;  %v189_v51 = vpop.permute.xlu1 %188 }
  0xaf   : > { %vm172_vm4 = vcmp.eq.s32.totalorder %v156_v46, %v171_v50  ;;  %vm173_vm5 = vcmp.eq.s32.totalorder %v157_v49, %v171_v50  ;;  %vm190_vm8 = vcmp.eq.s32.totalorder %v156_v46, %v189_v51  ;;  %vm191_vm12 = vcmp.eq.s32.totalorder %v157_v49, %v189_v51 }
  0xb0   : > { %vm174_vm7 = vmor %vm165_vm3, %vm172_vm4 }
  0xb1   : > { %vm175_vm10 = vmor %vm166_vm6, %vm173_vm5 }
  0xb2   : > { %vm183_vm11 = vmor %vm174_vm7, %vm181_vm9 }
  0xb3   : > { %vm192_vm14 = vmor %vm183_vm11, %vm190_vm8 }
  0xb4   : > { %vm184_vm15 = vmor %vm175_vm10, %vm182_vm13 }
  0xb5   : > { %vm193_vm0 = vmor %vm184_vm15, %vm191_vm12 }
  0xb6   : > { %396 = vmatprep.mubr.msk.f32.mxu0 %vm193_vm0, %v598_v52 }
  0xb7   : > { %397 = vmatmul.mubr.msk.f32.vlgmr.msra.gmra.mxu0 %vm192_vm14, %v598_v52 }
 0x177   : > { %v434_v53 = vpop.f32.mrf.mxu0 }
 0x179   : > { %v435_v54 = vpop.f32.mrf.mxu0 }
 0x17a   : > { %v436_v55 = vadd.f32 %v435_v54, %v434_v53 }
 0x17c   : > { %300 = vst [vmem:[%s149_s14] sm:$0xff] %v436_v55 }
 0x17d   : > { %538 = shalt.err (!%p535_p0)
}
 0x17e   : > { %s539_s27 = scalar_lea.hbm %s313_s22, 128  ;;  %s543_s30 = scalar_lea.hbm %s734_s2, 384 }
 0x17f   : > { %p540_p1 = scmp.ne.s32.totalorder %s313_s22, %s539_s27  ;;  %p544_p4 = scmp.lt.s32.totalorder %s313_s22, %s734_s2 }
 0x180   : > { %p545_p7 = scmp.lt.s32.totalorder %s543_s30, %s539_s27 }
 0x181   : > { %p541_p2 = pnand %p540_p1, %p653_p5 }
 0x182   : > { %p546_p8 = por %p545_p7, %p544_p4 }
 0x183   : > { %p542_p3 = pneg %p541_p2 }
 0x185   : > { %p547_p6 = pnand %p546_p8, %p542_p3 }
 0x187   : > { %550 = shalt.err (!%p547_p6)
}
 0x188   : > { %441 = dma.vmem_to_hbm [thread:$0]  (%p653_p5), %s316_s16, 128, %s313_s22, %s302_s23  }
 0x189 PF: > { %p453_p9 = scmp.ge.s32.totalorder %s589_s12, 2  ;;  %s327_s5 = sand.u32 1, %s577_s9  }
 0x18a   : > { %p740_p10 = scmp.ne.s32.totalorder %s736_s20, 0  ;;  %s328_s6 = scalar_lea.sflag [#allocation4], %s327_s5 }
 0x18c   : > { %p448_p11 = pnand %p453_p9, %p740_p10 }
 0x18e   : > { %p449_p12 = pneg %p448_p11 }
 0x190   : > { %572 = dma.done.wait (%p449_p12), %s328_s6, 128  }
 0x191   : > { %574 = vsyncadd (%p449_p12), %s328_s6, 4294967168  ;;  %p13_p13 = scmp.ge.s32.totalorder %s640_s15, 5   ;;  %s741_s9 = smov %s581_s10 }
 0x192   : > { %s742_s10 = smov %s585_s11  ;;  %s743_s11 = smov %s651_s18 }
 0x193   : > { %s744_s12 = smov %s640_s15  ;;  %15 = sbr.rel (!%p13_p13) target bundleno = 4 (0x4), region = 68 }
 0x198   :  { %333 = vsyncpa [#allocation3], 1 }
 0x199   :  { %335 = vsyncpa [#allocation3 + $0x1], 1 }
 0x19a   :  { %336 = vsyncpa [#allocation4], 1 }
 0x19b   :  { %338 = vsyncpa [#allocation4 + $0x1], 1 }

</bundles_post_ra>
